<compile_context>
chip_gen: v7x
topology: tpu7x:2x2x1
jax: 0.10.0
libtpu: 0.0.40
codegen_flags: <defaults>
</compile_context>

<pallas_src>
import jax
import jax.numpy as jnp
from jax.experimental import pallas as pl
from jax.experimental.pallas import tpu as pltpu

NUM_LABELS = 3
LATENT_SIZE = 256


def _round_up(a, b):
    return ((a + b - 1) // b) * b


def _genedistr_kernel(x_ref, y_ref, w1x_ref, w1y_ref, b1_ref, w2_ref, b2_ref,
                      o_ref):
    # x_ref:   (TB, input_size) f32      y_ref:  (TB, 3) f32
    # w1x_ref: (input_size, 256) bf16    w1y_ref:(3, 256) f32   b1_ref:(1, 256) f32
    # w2_ref:  (256, TH) bf16            b2_ref: (1, TH) f32
    # o_ref:   (TB, TH) f32
    #
    # Fused "concat": cat([x, y]) @ W1 == x @ W1x + y @ W1y.  The x-part runs on
    # the MXU in bf16 (f32 accumulation); the K=3 y-part is done as VPU
    # broadcast-FMAs in f32 (a K=3 matmul would waste a full MXU push at <2%
    # utilization).
    x_bf = x_ref[...].astype(jnp.bfloat16)
    h = jnp.dot(x_bf, w1x_ref[...], preferred_element_type=jnp.float32)
    h = h + b1_ref[...]
    yv = y_ref[...]            # (TB, 3) f32
    w1y = w1y_ref[...]         # (3, 256) f32
    for k in range(w1y.shape[0]):            # static unroll (3 FMAs)
        h = h + yv[:, k:k + 1] * w1y[k:k + 1, :]
    # LeakyReLU (negative_slope = 0.01, PyTorch default), in f32.
    h = jnp.where(h >= 0.0, h, 0.01 * h)
    # Second layer on the MXU, bf16 operands, f32 accumulation.
    o = jnp.dot(h.astype(jnp.bfloat16), w2_ref[...],
                preferred_element_type=jnp.float32)
    o = o + b2_ref[...]
    # ReLU
    o_ref[...] = jnp.maximum(o, 0.0).astype(o_ref.dtype)


def _choose_tile_b(B, tile_b_max):
    """Batch tile: multiple of 8 (or the full B when B < 8).  When B allows,
    aim for >= 4 grid steps so v7x's dual TensorCores both get work and the
    pipeline has depth."""
    if B <= 8:
        return B if B < 8 else 8
    target = _round_up(pl.cdiv(B, 4), 8)
    return max(8, min(tile_b_max, target))


def _choose_tile_h(H, tile_h_max):
    """Output-feature tile: the full H when it fits (no lane padding, no extra
    output write traffic for small hidden_size); otherwise a multiple of 128
    so output stores stay lane-dense.  Ragged boundaries are masked by Pallas."""
    if H <= tile_h_max:
        return H
    return tile_h_max


def _vmem_budget_bytes(tile_b, tile_h, in_size, n_labels, latent):
    lane = lambda n: _round_up(n, 128)
    sub = lambda n: _round_up(n, 8)
    b = 0
    b += 2 * tile_b * lane(in_size) * 4      # x tile (f32), double-buffered
    b += 2 * tile_b * lane(n_labels) * 4     # y tile (f32)
    b += 2 * sub(in_size) * lane(latent) * 2 # w1x (bf16), resident
    b += 2 * sub(n_labels) * lane(latent) * 4
    b += 2 * sub(1) * lane(latent) * 4       # b1
    b += 2 * latent * lane(tile_h) * 2       # w2 block (bf16)
    b += 2 * sub(1) * lane(tile_h) * 4       # b2 block
    b += 2 * tile_b * lane(tile_h) * 4       # out block (f32)
    return b


def gene_distr_net_forward(x, y, params, *, tile_b_max=1024, tile_h_max=512,
                           out_dtype=jnp.float32):
    """x: (B, input_size) f32, y: (B, 3) f32 -> (B, hidden_size) out_dtype."""
    w1x, w1y, b1, w2, b2 = (
        params["w1x"], params["w1y"], params["b1"], params["w2"], params["b2"]
    )
    B, in_size = x.shape
    n_labels = y.shape[1]
    latent = w2.shape[0]
    H = w2.shape[1]
    K1 = in_size + n_labels

    # MXU operands in bf16 (kernel accumulates in f32).  In production, store
    # the weights in bf16 to avoid this one-off cast.
    if w1x.dtype != jnp.bfloat16:
        w1x = w1x.astype(jnp.bfloat16)
    if w2.dtype != jnp.bfloat16:
        w2 = w2.astype(jnp.bfloat16)
    # w1y / biases stay f32: they are consumed on the VPU.

    tile_b = _choose_tile_b(B, tile_b_max)
    tile_h_max = max(128, (tile_h_max // 128) * 128)
    tile_h = _choose_tile_h(H, tile_h_max)
    grid = (pl.cdiv(B, tile_b), pl.cdiv(H, tile_h))

    budget = _vmem_budget_bytes(tile_b, tile_h, in_size, n_labels, latent)
    # Headroom for compiler scratch; clamp to [32 MiB, 64 MiB] so we never
    # exceed v7x's 64 MiB physical VMEM while still raising the default limit.
    vmem_limit = int(min(max(budget + (8 << 20), 32 << 20), 64 << 20))

    flops = 2 * B * (K1 * latent + latent * H)
    bytes_accessed = (
        grid[1] * B * (in_size + n_labels) * 4   # x/y re-read per H tile
        + B * H * 4                               # output
        + in_size * latent * 2 + n_labels * latent * 4 + latent * 4
        + latent * H * 2 + H * 4                  # parameters
    )

    out = pl.pallas_call(
        _genedistr_kernel,
        out_shape=jax.ShapeDtypeStruct((B, H), out_dtype),
        grid=grid,
        in_specs=[
            pl.BlockSpec((tile_b, in_size), lambda i, j: (i, 0)),   # x tile
            pl.BlockSpec((tile_b, n_labels), lambda i, j: (i, 0)),  # y tile
            pl.BlockSpec(w1x.shape, lambda i, j: (0, 0)),           # resident
            pl.BlockSpec(w1y.shape, lambda i, j: (0, 0)),           # resident
            pl.BlockSpec(b1.shape, lambda i, j: (0, 0)),            # resident
            pl.BlockSpec((latent, tile_h), lambda i, j: (0, j)),    # w2 tile
            pl.BlockSpec((1, tile_h), lambda i, j: (0, j)),         # b2 tile
        ],
        out_specs=pl.BlockSpec((tile_b, tile_h), lambda i, j: (i, j)),
        compiler_params=pltpu.CompilerParams(
            dimension_semantics=("parallel", "parallel"),
            vmem_limit_bytes=vmem_limit,
        ),
        cost_estimate=pl.CostEstimate(
            flops=flops, transcendentals=0, bytes_accessed=bytes_accessed
        ),
    )(x, y, w1x, w1y, b1, w2, b2)
    return out


def _xavier_uniform(key, fan_in, fan_out, gain):
    # Matches torch.nn.init.xavier_uniform_(weight, gain): weight is (out, in),
    # fan_in/fan_out computed from that shape; we store the transpose (in, out).
    bound = gain * jnp.sqrt(6.0 / (fan_in + fan_out))
    return jax.random.uniform(
        key, (fan_in, fan_out), minval=-bound, maxval=bound, dtype=jnp.float32
    )


def init_params(key, input_size, hidden_size):
    k1, k2, k3, k4 = jax.random.split(key, 4)
    in1 = input_size + NUM_LABELS
    # Weights: xavier_uniform with gain 0.5 (from initial_params()); w1 is
    # drawn as the full (in1, 256) matrix then split so the fused
    # x@W1x + y@W1y exactly equals cat([x,y]) @ W1.
    w1 = _xavier_uniform(k1, in1, LATENT_SIZE, gain=0.5)
    w2 = _xavier_uniform(k2, LATENT_SIZE, hidden_size, gain=0.5)
    # Biases keep PyTorch Linear default init: U(-1/sqrt(fan_in), 1/sqrt(fan_in)).
    bnd1 = 1.0 / jnp.sqrt(jnp.float32(in1))
    bnd2 = 1.0 / jnp.sqrt(jnp.float32(LATENT_SIZE))
    b1 = jax.random.uniform(k3, (1, LATENT_SIZE), minval=-bnd1, maxval=bnd1,
                            dtype=jnp.float32)
    b2 = jax.random.uniform(k4, (1, hidden_size), minval=-bnd2, maxval=bnd2,
                            dtype=jnp.float32)
    return {
        "w1x": w1[:input_size],
        "w1y": w1[input_size:],
        "b1": b1,
        "w2": w2,
        "b2": b2,
    }


if __name__ == "__main__":
    # TODO(synk): the torch optimizer construction and .cuda() move are
    # host/device bookkeeping, not part of the forward compute; not translated.
    key = jax.random.PRNGKey(0)
    kx, ky, kp = jax.random.split(key, 3)

    batch = 8
    input_size = 16
    hidden_size = 32

    x = jax.random.normal(kx, (batch, input_size), dtype=jnp.float32)
    y = jax.random.normal(ky, (batch, NUM_LABELS), dtype=jnp.float32)
    params = init_params(kp, input_size, hidden_size)

    out = gene_distr_net_forward(x, y, params)
    jax.block_until_ready(out)

    # Pure-f32 JAX reference (equivalent to the concat formulation).  The
    # kernel rounds MXU operands to bf16, so use a loosened tolerance.
    xy = jnp.concatenate([x, y], axis=1)
    w1_full = jnp.concatenate([params["w1x"], params["w1y"]], axis=0)
    h_ref = xy @ w1_full + params["b1"]
    h_ref = jnp.where(h_ref >= 0, h_ref, 0.01 * h_ref)
    o_ref = jnp.maximum(h_ref @ params["w2"] + params["b2"], 0.0)
    assert out.shape == (batch, hidden_size)
    assert out.dtype == jnp.float32
    assert jnp.allclose(out, o_ref, atol=1e-2, rtol=1e-2)

    print("KERNEL_OK")
</pallas_src>

<mosaic_0001>
module attributes {stable_mosaic.version = 11 : i64} {
  func.func @_genedistr_kernel(%arg0: i32, %arg1: i32, %arg2: memref<8x16xf32, #tpu.memory_space<vmem>>, %arg3: memref<8x3xf32, #tpu.memory_space<vmem>>, %arg4: memref<16x256xbf16, #tpu.memory_space<vmem>>, %arg5: memref<3x256xf32, #tpu.memory_space<vmem>>, %arg6: memref<1x256xf32, #tpu.memory_space<vmem>>, %arg7: memref<256x32xbf16, #tpu.memory_space<vmem>>, %arg8: memref<1x32xf32, #tpu.memory_space<vmem>>, %arg9: memref<8x32xf32, #tpu.memory_space<vmem>>) attributes {dimension_semantics = [#tpu.dimension_semantics<parallel>, #tpu.dimension_semantics<parallel>], iteration_bounds = array<i64: 1, 1>, scalar_prefetch = 0 : i64, scratch_operands = 0 : i64, tpu.core_type = #tpu.core_type<tc>, window_params = [{transform_indices = @transform_0, window_bounds = array<i64: 8, 16>}, {transform_indices = @transform_1, window_bounds = array<i64: 8, 3>}, {pipeline_mode = #tpu.pipeline_mode<synchronous>, transform_indices = @transform_2, window_bounds = array<i64: 16, 256>}, {pipeline_mode = #tpu.pipeline_mode<synchronous>, transform_indices = @transform_3, window_bounds = array<i64: 3, 256>}, {pipeline_mode = #tpu.pipeline_mode<synchronous>, transform_indices = @transform_4, window_bounds = array<i64: 1, 256>}, {transform_indices = @transform_5, window_bounds = array<i64: 256, 32>}, {transform_indices = @transform_6, window_bounds = array<i64: 1, 32>}, {transform_indices = @transform_7, window_bounds = array<i64: 8, 32>}]} {
    %c0 = arith.constant 0 : index
    %c0_0 = arith.constant 0 : index
    %0 = vector.load %arg2[%c0, %c0_0] : memref<8x16xf32, #tpu.memory_space<vmem>>, vector<8x16xf32>
    %1 = arith.truncf %0 : vector<8x16xf32> to vector<8x16xbf16>
    %c0_1 = arith.constant 0 : index
    %c0_2 = arith.constant 0 : index
    %2 = vector.load %arg4[%c0_1, %c0_2] : memref<16x256xbf16, #tpu.memory_space<vmem>>, vector<16x256xbf16>
    %cst = arith.constant dense<0.000000e+00> : vector<8x256xf32>
    %3 = tpu.matmul %1, %2, %cst {dimension_numbers = #tpu.dot_dimension_numbers<[1], [0], [0], [1], [0, 0, 1, 1], [], []>} : vector<8x16xbf16>, vector<16x256xbf16>, vector<8x256xf32> -> vector<8x256xf32>
    %c0_3 = arith.constant 0 : index
    %c0_4 = arith.constant 0 : index
    %4 = vector.load %arg6[%c0_3, %c0_4] : memref<1x256xf32, #tpu.memory_space<vmem>>, vector<1x256xf32>
    %5 = vector.broadcast %4 : vector<1x256xf32> to vector<8x256xf32>
    %6 = arith.addf %3, %5 : vector<8x256xf32>
    %c0_5 = arith.constant 0 : index
    %c0_6 = arith.constant 0 : index
    %7 = vector.load %arg3[%c0_5, %c0_6] : memref<8x3xf32, #tpu.memory_space<vmem>>, vector<8x3xf32>
    %c0_7 = arith.constant 0 : index
    %c0_8 = arith.constant 0 : index
    %8 = vector.load %arg5[%c0_7, %c0_8] : memref<3x256xf32, #tpu.memory_space<vmem>>, vector<3x256xf32>
    %9 = vector.extract_strided_slice %7 {offsets = [0, 0], sizes = [8, 1], strides = [1, 1]} : vector<8x3xf32> to vector<8x1xf32>
    %10 = vector.extract_strided_slice %8 {offsets = [0, 0], sizes = [1, 256], strides = [1, 1]} : vector<3x256xf32> to vector<1x256xf32>
    %11 = vector.broadcast %9 : vector<8x1xf32> to vector<8x256xf32>
    %12 = vector.broadcast %10 : vector<1x256xf32> to vector<8x256xf32>
    %13 = arith.mulf %11, %12 : vector<8x256xf32>
    %14 = arith.addf %6, %13 : vector<8x256xf32>
    %15 = vector.extract_strided_slice %7 {offsets = [0, 1], sizes = [8, 1], strides = [1, 1]} : vector<8x3xf32> to vector<8x1xf32>
    %16 = vector.extract_strided_slice %8 {offsets = [1, 0], sizes = [1, 256], strides = [1, 1]} : vector<3x256xf32> to vector<1x256xf32>
    %17 = vector.broadcast %15 : vector<8x1xf32> to vector<8x256xf32>
    %18 = vector.broadcast %16 : vector<1x256xf32> to vector<8x256xf32>
    %19 = arith.mulf %17, %18 : vector<8x256xf32>
    %20 = arith.addf %14, %19 : vector<8x256xf32>
    %21 = vector.extract_strided_slice %7 {offsets = [0, 2], sizes = [8, 1], strides = [1, 1]} : vector<8x3xf32> to vector<8x1xf32>
    %22 = vector.extract_strided_slice %8 {offsets = [2, 0], sizes = [1, 256], strides = [1, 1]} : vector<3x256xf32> to vector<1x256xf32>
    %23 = vector.broadcast %21 : vector<8x1xf32> to vector<8x256xf32>
    %24 = vector.broadcast %22 : vector<1x256xf32> to vector<8x256xf32>
    %25 = arith.mulf %23, %24 : vector<8x256xf32>
    %26 = arith.addf %20, %25 : vector<8x256xf32>
    %cst_9 = arith.constant 0.000000e+00 : f32
    %27 = vector.broadcast %cst_9 : f32 to vector<8x256xf32>
    %28 = arith.cmpf oge, %26, %27 : vector<8x256xf32>
    %cst_10 = arith.constant 0.00999999977 : f32
    %29 = vector.broadcast %cst_10 : f32 to vector<8x256xf32>
    %30 = arith.mulf %29, %26 : vector<8x256xf32>
    %31 = arith.select %28, %26, %30 : vector<8x256xi1>, vector<8x256xf32>
    %32 = arith.truncf %31 : vector<8x256xf32> to vector<8x256xbf16>
    %c0_11 = arith.constant 0 : index
    %c0_12 = arith.constant 0 : index
    %33 = vector.load %arg7[%c0_11, %c0_12] : memref<256x32xbf16, #tpu.memory_space<vmem>>, vector<256x32xbf16>
    %cst_13 = arith.constant dense<0.000000e+00> : vector<8x32xf32>
    %34 = tpu.matmul %32, %33, %cst_13 {dimension_numbers = #tpu.dot_dimension_numbers<[1], [0], [0], [1], [0, 0, 1, 1], [], []>} : vector<8x256xbf16>, vector<256x32xbf16>, vector<8x32xf32> -> vector<8x32xf32>
    %c0_14 = arith.constant 0 : index
    %c0_15 = arith.constant 0 : index
    %35 = vector.load %arg8[%c0_14, %c0_15] : memref<1x32xf32, #tpu.memory_space<vmem>>, vector<1x32xf32>
    %36 = vector.broadcast %35 : vector<1x32xf32> to vector<8x32xf32>
    %37 = arith.addf %34, %36 : vector<8x32xf32>
    %cst_16 = arith.constant 0.000000e+00 : f32
    %38 = vector.broadcast %cst_16 : f32 to vector<8x32xf32>
    %39 = arith.maximumf %37, %38 : vector<8x32xf32>
    %c0_17 = arith.constant 0 : index
    %c0_18 = arith.constant 0 : index
    %40 = vector.load %arg9[%c0_17, %c0_18] : memref<8x32xf32, #tpu.memory_space<vmem>>, vector<8x32xf32>
    tpu.vector_store %arg9[%c0_17, %c0_18], %39 {strides = array<i32>} : memref<8x32xf32, #tpu.memory_space<vmem>>, vector<8x32xf32>,
    return
  }
  func.func @transform_0(%arg0: i32, %arg1: i32) -> (i32, i32) {
    %c0_i32 = arith.constant 0 : i32
    %c0_i32_0 = arith.constant 0 : i32
    return %arg0, %c0_i32 : i32, i32
  }
  func.func @transform_1(%arg0: i32, %arg1: i32) -> (i32, i32) {
    %c0_i32 = arith.constant 0 : i32
    %c0_i32_0 = arith.constant 0 : i32
    return %arg0, %c0_i32 : i32, i32
  }
  func.func @transform_2(%arg0: i32, %arg1: i32) -> (i32, i32) {
    %c0_i32 = arith.constant 0 : i32
    %c0_i32_0 = arith.constant 0 : i32
    %c0_i32_1 = arith.constant 0 : i32
    return %c0_i32, %c0_i32_0 : i32, i32
  }
  func.func @transform_3(%arg0: i32, %arg1: i32) -> (i32, i32) {
    %c0_i32 = arith.constant 0 : i32
    %c0_i32_0 = arith.constant 0 : i32
    %c0_i32_1 = arith.constant 0 : i32
    return %c0_i32, %c0_i32_0 : i32, i32
  }
  func.func @transform_4(%arg0: i32, %arg1: i32) -> (i32, i32) {
    %c0_i32 = arith.constant 0 : i32
    %c0_i32_0 = arith.constant 0 : i32
    %c0_i32_1 = arith.constant 0 : i32
    return %c0_i32, %c0_i32_0 : i32, i32
  }
  func.func @transform_5(%arg0: i32, %arg1: i32) -> (i32, i32) {
    %c0_i32 = arith.constant 0 : i32
    %c0_i32_0 = arith.constant 0 : i32
    return %c0_i32, %arg1 : i32, i32
  }
  func.func @transform_6(%arg0: i32, %arg1: i32) -> (i32, i32) {
    %c0_i32 = arith.constant 0 : i32
    %c0_i32_0 = arith.constant 0 : i32
    return %c0_i32, %arg1 : i32, i32
  }
  func.func @transform_7(%arg0: i32, %arg1: i32) -> (i32, i32) {
    %c0_i32 = arith.constant 0 : i32
    return %arg0, %arg1 : i32, i32
  }
}

</mosaic_0001>

<bundles_post_ra>
// kernel: tpu_custom_call.1
= control target key start
LH: loop header
LB: loop body
LE: loop exit
PB: predicated region body
PF: predicated region fallthrough
CT: control target
= control target key end

     0   :  { %v474_v2 = vmov 0   ;;  %vm54_vm0 = vcmask 130048   ;;  %v475_v7 = vmov 2   ;;  %v476_v11 = vmov 1   ;;  %s599_s0 = inlined_call_operand.vmem [shape: f32[8,16], index: 0, kind: input, shape index: {}]   ;;  %s600_s1 = inlined_call_operand.vmem [shape: f32[8,3], index: 1, kind: input, shape index: {}]   ;;  %s601_s2 = inlined_call_operand.vmem [shape: bf16[16,256], index: 2, kind: input, shape index: {}]   ;;  %s602_s3 = inlined_call_operand.vmem [shape: f32[3,256], index: 3, kind: input, shape index: {}]   ;;  %s603_s4 = inlined_call_operand.vmem [shape: f32[1,256], index: 4, kind: input, shape index: {}]   ;;  %s604_s5 = inlined_call_operand.vmem [shape: bf16[256,32], index: 5, kind: input, shape index: {}]   ;;  %s605_s6 = inlined_call_operand.vmem [shape: f32[1,32], index: 6, kind: input, shape index: {}]   ;;  %s606_s7 = inlined_call_operand.hbm [shape: f32[8,32], index: 7, kind: output, shape index: {}]  }
   0x1   :  { %v431_v0 = vld [vmem:[%s601_s2 + $0x4] ss:$8 sps:$4 sm:$0xff]   ;;  %v433_v1 = vld [vmem:[%s601_s2] ss:$8 sps:$4 sm:$0xff]   ;;  %90 = vmatprep.mubr.bf16.mxu0 %v474_v2  ;;  %427 = vset.pattern.permute.xlu0 %v474_v2  ;;  %v438_v12 = vld [vmem:[%s604_s5 + $0x50] sm:$0xff]  }
   0x2   :  { %v28_v3 = vld [vmem:[%s599_s0] sm:$0xff]  ;;  %58 = vmatprep.subr.bf16.mxu0 %v431_v0  ;;  %429 = vset.pattern.permute.xlu1 %v475_v7  ;;  %v436_v9 = vld [vmem:[%s604_s5 + $0x48] sm:$0xff]   ;;  %v439_v13 = vld [vmem:[%s604_s5 + $0x10] sm:$0xff]  }
   0x3   :  { %v99_v4 = vld [vmem:[%s600_s1] sm:$0xff]  ;;  %v29_v5 = vpack.c.bf16 %v28_v3, %v28_v3  ;;  %59 = vmatpush1.bf16.msra.mxu0 %v433_v1  ;;  %v437_v10 = vld [vmem:[%s604_s5 + $0x8] sm:$0xff]   ;;  %v440_v14 = vld [vmem:[%s604_s5 + $0x58] sm:$0xff]  }
   0x4   :  { %103 = vperm.xlu0 %427, %v99_v4   ;;  %v434_v6 = vld [vmem:[%s604_s5 + $0x40] sm:$0xff]   ;;  %156 = vperm.xlu1 %429, %v99_v4   ;;  %v441_v15 = vld [vmem:[%s604_s5 + $0x18] sm:$0xff]  }
   0x5   :  { %v435_v8 = vld [vmem:[%s604_s5] sm:$0xff]   ;;  %401 = vmatprep.subr.bf16.mxu1 %v434_v6 }
   0x6   :  { %402 = vmatpush3.bf16.msra.mxu1 %v435_v8  ;;  %383 = vmatmul.mubr.msk.bf16.vlgmr.msra.gmra.mrb[0].mxu0 %vm54_vm0, %v29_v5 }
   0x7   :  { %403 = vmatprep.subr.bf16.mxu1 %v436_v9 }
   0x8   :  { %428 = vset.pattern.permute.xlu0 %v476_v11 }
   0x9   :  { %130 = vperm.xlu0 %428, %v99_v4  }
   0xa   :  { %404 = vmatpush3.bf16.msra.mxu1 %v437_v10 }
   0xb   :  { %405 = vmatprep.subr.bf16.mxu1 %v438_v12 }
   0xd   :  { %430 = vset.pattern.permute.xlu0 %v475_v7 }
   0xe   :  { %406 = vmatpush3.bf16.msra.mxu1 %v439_v13 }
   0xf   :  { %407 = vmatprep.subr.bf16.mxu1 %v440_v14 }
  0x10   :  { %12 = vsyncpa [#allocation3], 0  ;;  %v442_v16 = vld [vmem:[%s604_s5 + $0x60] sm:$0xff]   ;;  %v444_v18 = vld [vmem:[%s604_s5 + $0x68] sm:$0xff]   ;;  %v34_v24 = vlaneseq  ;;  %s477_s15 = smov [#allocation2]   ;;  %vm365_vm3 = vcmask 261120  }
  0x11   :  { %v443_v17 = vld [vmem:[%s604_s5 + $0x20] sm:$0xff]   ;;  %v445_v19 = vld [vmem:[%s604_s5 + $0x28] sm:$0xff]   ;;  %v446_v20 = vld [vmem:[%s604_s5 + $0x70] sm:$0xff]   ;;  %s373_s16 = sshll.u32 %s477_s15, 4  ;;  %s374_s16 = int_to_ptr.vmem [resolvable:$true] %s373_s16 }
  0x12   :  { %408 = vmatpush3.bf16.msra.mxu1 %v441_v15  ;;  %v447_v21 = vld [vmem:[%s604_s5 + $0x30] sm:$0xff]   ;;  %v448_v22 = vld [vmem:[%s604_s5 + $0x78] sm:$0xff]   ;;  %v35_v25 = vshrl.u32 %v34_v24, 7  ;;  %v100_v28 = vld [vmem:[%s602_s3] sm:$0x77]  ;;  %s450_s17 = scalar_lea.vmem %s374_s16, 128  ;;  %p455_p1 = scmp.lt.s32.totalorder %s374_s16, %s374_s16 }
  0x13   :  { %409 = vmatprep.subr.bf16.mxu1 %v442_v16  ;;  %v449_v23 = vld [vmem:[%s604_s5 + $0x38] sm:$0xff]   ;;  %v32_v37 = vld [vmem:[%s603_s4] sm:$0x3]  ;;  %p451_p0 = scmp.ne.s32.totalorder %s374_s16, %s450_s17  ;;  %p456_p2 = scmp.lt.s32.totalorder %s450_s17, %s450_s17 }
  0x14   :  { %v36_v26 = vsub.s32 0, %v35_v25  ;;  %v40_v27 = vsub.s32 1, %v35_v25  ;;  %v113_v29 = vsub.s32 4, %v35_v25  ;;  %v139_v30 = vsub.s32 5, %v35_v25  ;;  %v384_v12 = vld [vmem:[%s605_s6] ss:$0 sm:$0xff] }
  0x15   :  { %v161_v31 = vsub.s32 2, %v35_v25  ;;  %v165_v33 = vsub.s32 6, %v35_v25  ;;  %p457_p3 = por %p456_p2, %p455_p1 }
  0x16   :  { %410 = vmatpush3.bf16.msra.mxu1 %v443_v17  ;;  %v110_v34 = vrot.slane %v100_v28, %v36_v26  ;;  %v136_v35 = vrot.slane %v100_v28, %v40_v27  ;;  %v114_v36 = vrot.slane %v100_v28, %v113_v29  ;;  %v140_v38 = vrot.slane %v100_v28, %v139_v30 }
  0x17   :  { %411 = vmatprep.subr.bf16.mxu1 %v444_v18  ;;  %v162_v39 = vrot.slane %v100_v28, %v161_v31  ;;  %v166_v40 = vrot.slane %v100_v28, %v165_v33  ;;  %v37_v42 = vrot.slane %v32_v37, %v36_v26  ;;  %v41_v45 = vrot.slane %v32_v37, %v40_v27  ;;  %p458_p4 = pnand %p457_p3, %p451_p0 }
  0x18   :  { %v120_v41 = vrot.slane %v110_v34, %v36_v26  ;;  %v146_v43 = vrot.slane %v136_v35, %v40_v27  ;;  %v124_v44 = vrot.slane %v114_v36, %v36_v26  ;;  %v150_v47 = vrot.slane %v140_v38, %v40_v27 }
  0x19   :  { %v172_v48 = vrot.slane %v162_v39, %v161_v31  ;;  %v176_v51 = vrot.slane %v166_v40, %v161_v31 }
  0x1a   :  { %412 = vmatpush3.bf16.msra.mxu1 %v445_v19 }
  0x1b   :  { %413 = vmatprep.subr.bf16.mxu1 %v446_v20 }
  0x1e   :  { %414 = vmatpush3.bf16.msra.mxu1 %v447_v21 }
  0x1f   :  { %415 = vmatprep.subr.bf16.mxu1 %v448_v22 }
  0x22   :  { %416 = vmatpush3.bf16.msra.mxu1 %v449_v23 }
  0x83   :  { %v104_v32 = vpop.permute.xlu0 %103  ;;  %v157_v50 = vpop.permute.xlu1 %156 }
  0x84   :  { %v125_v52 = vmul.f32 %v120_v41, %v104_v32  ;;  %v126_v56 = vmul.f32 %v124_v44, %v104_v32  ;;  %v177_v62 = vmul.f32 %v172_v48, %v157_v50  ;;  %v178_v0 = vmul.f32 %v176_v51, %v157_v50 }
  0x88   :  { %v131_v46 = vpop.permute.xlu0 %130 }
  0x89   :  { %v151_v55 = vmul.f32 %v146_v43, %v131_v46  ;;  %v152_v58 = vmul.f32 %v150_v47, %v131_v46 }
  0xd9   :  { %v92_v49 = vpop.f32.mrb[0].mxu0 }
  0xda   :  { %v93_v53 = vadd.f32 %v92_v49, %v37_v42  ;;  %v94_v54 = vpop.f32.mrb[1].mxu0 }
  0xdb   :  { %v95_v57 = vadd.f32 %v94_v54, %v41_v45  ;;  %v96_v59 = vpop.f32.mrb[2].mxu0 }
  0xdc   :  { %v127_v60 = vadd.f32 %v125_v52, %v93_v53  ;;  %v97_v61 = vpop.f32.mrb[3].mxu0 }
  0xdd   :  { %v128_v63 = vadd.f32 %v126_v56, %v95_v57 }
  0xde   :  { %v153_v1 = vadd.f32 %v151_v55, %v127_v60 }
  0xdf   :  { %v154_v2 = vadd.f32 %v152_v58, %v128_v63 }
  0xe0   :  { %v179_v3 = vadd.f32 %v177_v62, %v153_v1 }
  0xe1   :  { %v180_v4 = vadd.f32 %v178_v0, %v154_v2 }
  0xe2   :  { %v183_v5 = vmul.f32 0.01, %v179_v3  ;;  %vm181_vm1 = vcmp.ge.f32.partialorder %v179_v3, 0.0 }
  0xe3   :  { %vm182_vm2 = vcmp.ge.f32.partialorder %v180_v4, 0.0  ;;  %v184_v6 = vmul.f32 0.01, %v180_v4 }
  0xe4   :  { %v185_v7 = vsel %vm181_vm1, %v179_v3, %v183_v5 }
  0xe5   :  { %v186_v8 = vsel %vm182_vm2, %v180_v4, %v184_v6  ;;  %v187_v10 = vpack.c.bf16 %v185_v7, %v185_v7 }
  0xe6   :  { %v188_v9 = vpack.c.bf16 %v186_v8, %v186_v8 }
  0xe8   :  { %356 = vmatprep.mubr.bf16.mxu1 %v188_v9 }
  0xe9   :  { %357 = vmatmul.mubr.bf16.vlgmr.msra.gmra.mrb[0].mxu1 %v187_v10 }
 0x1bc   :  { %v417_v11 = vpop.f32.mrb[0].mxu1 }
 0x1bd   :  { %v418_v13 = vpop.f32.mrb[1].mxu1 }
 0x1be   :  { %v419_v14 = vadd.f32 %v418_v13, %v417_v11  ;;  %v420_v15 = vpop.f32.mrb[2].mxu1 }
 0x1bf   :  { %v421_v16 = vpop.f32.mrb[3].mxu1 }
 0x1c0   :  { %v359_v17 = vadd.f32 %v419_v14, %v384_v12 }
 0x1c2   :  { %v364_v18 = vmax.f32 %v359_v17, 0.0 }
 0x1c4   :  { %366 = vst.msk [vmem:[#allocation2] sm:$0xff] %vm365_vm3, %v364_v18 }
 0x1c5   :  { %461 = shalt.err (!%p458_p4)
}
 0x1c6   :  { %s462_s19 = scalar_lea.hbm %s606_s7, 128 }
 0x1c7   :  { %p463_p5 = scmp.ne.s32.totalorder %s606_s7, %s462_s19  ;;  %p466_p6 = scmp.lt.u32.totalorder %s462_s19, %s606_s7 }
 0x1c9   :  { %p468_p7 = pnand %p466_p6, %p463_p5 }
 0x1cb   :  { %471 = shalt.err (!%p468_p7)
}
 0x1cc   :  { %376 = dma.vmem_to_hbm [thread:$0]  %s374_s16, 128, %s606_s7, [#allocation3]  }
 0x1cd   :  { %472 = dma.done.wait [#allocation3], 128  }
 0x1ce   :  { %473 = vsyncadd [#allocation3], 4294967168 }
 0x1cf   :  { %380 = vsyncpa [#allocation3], 1 }

</bundles_post_ra>
